<compile_context>
chip_gen: v7x
topology: tpu7x:2x2x1
jax: 0.10.0
libtpu: 0.0.40
codegen_flags: <defaults>
</compile_context>

<pallas_src>
import functools
import math

import jax
import jax.numpy as jnp
from jax import lax
from jax.experimental import pallas as pl
from jax.experimental.pallas import tpu as pltpu

_SUBLANES = 8


def _device_kind() -> str:
    try:
        return jax.devices()[0].device_kind.lower()
    except Exception:  # defensive: detection failure just disables the 2-way split
        return ""


def _pick_cols(shape, n):
    """Pick a lane-dense column width C dividing n (the reshape is then free)."""
    for c in (512, 1024, 256, 2048, 128, 4096, 8192):
        if n % c == 0:
            return c
    # Trailing-dim products of the original shape always divide n.
    cands = []
    p = 1
    for d in reversed(shape):
        p *= int(d)
        cands.append(p)
    good = [c for c in cands if 128 <= c <= 32768]
    if good:
        return min(good)
    if n <= 32768:
        return n       # tiny input: a single (1, n) block
    return None        # pathological flat size: caller uses the padded fallback


def _inverse_sum_kernel(x_ref, t_ref, o_ref, *, rows_total, tile_rows,
                        blocks_per_split, group, acc_rows, approx, any_ragged):
    """Accumulate sum(1/(x*t)) of the current (tile_rows, C) block into o_ref.

    o_ref is a small (acc_rows, C) f32 block mapped to the same block index for
    every step of the reduction axis (grid axis 1), so it stays resident in
    VMEM and acts as the accumulator for one grid split.  Work is chunked into
    `group`-row slabs so intermediates stay in vregs (no big VMEM round trip).
    """
    split = pl.program_id(0)
    k = pl.program_id(1)
    cols = x_ref.shape[1]
    num_groups = tile_rows // group
    # Intended global start row of this block.  It can exceed rows_total only
    # for the duplicated tail block of the 2-way split (the input index_map
    # clamps its DMA); that block is fully masked below.
    row0 = (split * blocks_per_split + k) * tile_rows

    @pl.when(k == 0)
    def _():
        o_ref[...] = jnp.zeros_like(o_ref)

    def partial_sum(masked):
        local_row = (lax.broadcasted_iota(jnp.int32, (group, 1), 0)
                     if masked else None)

        def body(g, acc):
            start = pl.multiple_of(g * group, group)
            xs = x_ref[pl.ds(start, group), :].astype(jnp.float32)
            ts = t_ref[pl.ds(start, group), :].astype(jnp.float32)
            prod = xs * ts
            recip = pl.reciprocal(prod, approx=True) if approx else 1.0 / prod
            if masked:
                # Mask the reciprocal (not the product) so garbage rows of a
                # partial edge block contribute exactly 0, robust to approx.
                valid = (row0 + start + local_row) < rows_total
                recip = jnp.where(valid, recip, 0.0)
            if group != acc_rows:
                # Fold 8-row slabs with static, vreg-aligned slices (pure VALU).
                folded = recip[0:acc_rows, :]
                for off in range(acc_rows, group, acc_rows):
                    folded = folded + recip[off:off + acc_rows, :]
                recip = folded
            return acc + recip

        return lax.fori_loop(0, num_groups, body,
                             jnp.zeros((acc_rows, cols), jnp.float32))

    if not any_ragged:
        o_ref[...] += partial_sum(False)
    else:
        is_edge = (row0 + tile_rows) > rows_total

        @pl.when(jnp.logical_not(is_edge))
        def _():                       # hot path: no masking at all
            o_ref[...] += partial_sum(False)

        @pl.when(is_edge)
        def _():                       # only the ragged / duplicated tail block(s)
            o_ref[...] += partial_sum(True)


def dknn_inverse_loss(dknn_output, truth, *, approx_reciprocal: bool = False,
                      block_budget_bytes: int | None = None,
                      n_splits: int | None = None) -> jax.Array:
    """Computes (1 / (dknn_output * truth)).sum() with a Pallas TPU kernel."""
    dknn_output = jnp.asarray(dknn_output)
    truth = jnp.asarray(truth)
    assert dknn_output.shape == truth.shape, "inputs must have the same shape"

    shape = dknn_output.shape
    n = math.prod(shape)
    if n == 0:
        return jnp.zeros((), jnp.float32)

    # Flatten only (free for contiguous arrays); no dtype cast in the wrapper —
    # the kernel casts per-chunk, so narrow dtypes keep a smaller HBM read.
    x = dknn_output.reshape(-1)
    t = truth.reshape(-1)

    pad_correction = 0
    C = _pick_cols(shape, n)
    if C is None:
        # Rare fallback (huge flat size with no usable divisor): pad with 1s so
        # every padded element contributes exactly 1.0, subtracted back below.
        C = 512
        pad = pl.cdiv(n, C) * C - n
        x = jnp.concatenate([x, jnp.ones((pad,), x.dtype)])
        t = jnp.concatenate([t, jnp.ones((pad,), t.dtype)])
        pad_correction = pad
        n = n + pad

    R = n // C
    x2 = x.reshape(R, C)
    t2 = t.reshape(R, C)
    itemsize = max(x2.dtype.itemsize, t2.dtype.itemsize)

    kind = _device_kind()
    is_v7x = "v7" in kind
    multi_tc = is_v7x or ("v4" in kind) or ("v5p" in kind)

    # ---- tile sizing (all Python ints at trace time) ----
    if block_budget_bytes is None:
        block_budget_bytes = 4 * 1024 * 1024     # per input, per pipeline buffer
    if R < 32:
        tile_rows = R                            # single block == full row dim
    else:
        tr = (block_budget_bytes // (C * itemsize)) // 32 * 32
        tile_rows = max(32, min(tr, ((R + 31) // 32) * 32))
    num_row_blocks = pl.cdiv(R, tile_rows)

    if n_splits is None:
        n_splits = 2 if (multi_tc and num_row_blocks >= 2) else 1
    n_splits = max(1, min(int(n_splits), num_row_blocks))
    bps = pl.cdiv(num_row_blocks, n_splits)
    total_blocks = n_splits * bps
    last_block = num_row_blocks - 1
    any_ragged = total_blocks * tile_rows > R

    if tile_rows % _SUBLANES == 0:
        acc_rows = _SUBLANES
        group = 16 if (tile_rows % 16 == 0 and C <= 2048) else _SUBLANES
    else:
        acc_rows = tile_rows
        group = tile_rows

    def in_map(c, k):
        # Clamp so a duplicated tail block (odd block count under the 2-way
        # split) re-reads the last real block; the kernel masks it to zero.
        return (jnp.minimum(c * bps + k, last_block), 0)

    out_map = lambda c, k: (c, 0, 0)

    working_set = 4 * tile_rows * C * itemsize + 4 * acc_rows * C * 4
    vmem_cap = (40 if is_v7x else 64) * 1024 * 1024
    vmem_limit = int(min(vmem_cap, max(32 * 1024 * 1024, int(1.5 * working_set))))

    covered = total_blocks * tile_rows * C
    cost = pl.CostEstimate(
        flops=3 * covered,
        transcendentals=covered if approx_reciprocal else 0,
        bytes_accessed=(n * (x2.dtype.itemsize + t2.dtype.itemsize)
                        + n_splits * acc_rows * C * 4),
    )

    kernel = functools.partial(
        _inverse_sum_kernel, rows_total=R, tile_rows=tile_rows,
        blocks_per_split=bps, group=group, acc_rows=acc_rows,
        approx=approx_reciprocal, any_ragged=any_ragged)

    partials = pl.pallas_call(
        kernel,
        out_shape=jax.ShapeDtypeStruct((n_splits, acc_rows, C), jnp.float32),
        grid_spec=pltpu.PrefetchScalarGridSpec(
            num_scalar_prefetch=0,
            grid=(n_splits, bps),
            in_specs=[pl.BlockSpec((tile_rows, C), in_map),
                      pl.BlockSpec((tile_rows, C), in_map)],
            out_specs=pl.BlockSpec((None, acc_rows, C), out_map),
        ),
        compiler_params=pltpu.CompilerParams(
            dimension_semantics=("parallel", "arbitrary"),
            vmem_limit_bytes=vmem_limit,
        ),
        cost_estimate=cost,
    )(x2, t2)

    # Tiny final collapse of the per-split (acc_rows, C) partials in plain JAX.
    loss = jnp.sum(partials)
    if pad_correction:
        loss = loss - jnp.float32(pad_correction)
    return loss


if __name__ == "__main__":
    key = jax.random.PRNGKey(0)

    # Values bounded away from zero so the reciprocal is well defined.
    cases = [
        ((16, 128), {}),                     # lane-dense, single small block
        ((3, 100), {}),                      # odd shape -> trailing-product layout
        ((2, 4, 32), {}),                    # multi-dim collapse
        # small block budget + forced 2-way split -> multi-block accumulation,
        # ragged masked edge block, and the clamped duplicate-block path
        ((300, 256), dict(block_budget_bytes=64 * 1024, n_splits=2)),
    ]

    ok = True
    for i, (shape, kw) in enumerate(cases):
        k1, k2 = jax.random.split(jax.random.fold_in(key, i))
        x = jax.random.uniform(k1, shape, jnp.float32, minval=0.5, maxval=1.5)
        t = jax.random.uniform(k2, shape, jnp.float32, minval=0.5, maxval=1.5)

        loss = jax.block_until_ready(dknn_inverse_loss(x, t, **kw))
        ref = jnp.sum(1.0 / (x * t))
        if not jnp.allclose(loss, ref, rtol=1e-4, atol=1e-4):
            ok = False
            print("MISMATCH", shape, float(loss), float(ref))

    assert ok
    print("KERNEL_OK")
</pallas_src>

<mosaic_0001>
module attributes {stable_mosaic.version = 11 : i64} {
  func.func @_inverse_sum_kernel(%arg0: i32, %arg1: i32, %arg2: memref<4x512xf32, #tpu.memory_space<vmem>>, %arg3: memref<4x512xf32, #tpu.memory_space<vmem>>, %arg4: memref<1x4x512xf32, #tpu.memory_space<vmem>>) attributes {dimension_semantics = [#tpu.dimension_semantics<parallel>, #tpu.dimension_semantics<arbitrary>], iteration_bounds = array<i64: 1, 1>, scalar_prefetch = 0 : i64, scratch_operands = 0 : i64, tpu.core_type = #tpu.core_type<tc>, window_params = [{transform_indices = @transform_0, window_bounds = array<i64: 4, 512>}, {transform_indices = @transform_1, window_bounds = array<i64: 4, 512>}, {transform_indices = @transform_2, window_bounds = array<i64: 1, 4, 512>}]} {
    %c0_i32 = arith.constant 0 : i32
    %0 = arith.cmpi eq, %arg1, %c0_i32 : i32
    %1 = arith.extui %0 : i1 to i32
    %c0_i32_0 = arith.constant 0 : i32
    %2 = arith.cmpi ne, %1, %c0_i32_0 : i32
    scf.if %2 {
      %cst_10 = arith.constant 0.000000e+00 : f32
      %20 = vector.broadcast %cst_10 : f32 to vector<4x512xf32>
      %c0_11 = arith.constant 0 : index
      %c0_12 = arith.constant 0 : index
      %c0_13 = arith.constant 0 : index
      %21 = vector.load %arg4[%c0_11, %c0_12, %c0_13] : memref<1x4x512xf32, #tpu.memory_space<vmem>>, vector<1x4x512xf32>
      %22 = vector.shape_cast %21 : vector<1x4x512xf32> to vector<4x512xf32>
      %23 = vector.shape_cast %20 : vector<4x512xf32> to vector<1x4x512xf32>
      tpu.vector_store %arg4[%c0_11, %c0_12, %c0_13], %23 {strides = array<i32>} : memref<1x4x512xf32, #tpu.memory_space<vmem>>, vector<1x4x512xf32>,
    } else {
    }
    %c0 = arith.constant 0 : index
    %c0_1 = arith.constant 0 : index
    %c0_2 = arith.constant 0 : index
    %3 = vector.load %arg4[%c0, %c0_1, %c0_2] : memref<1x4x512xf32, #tpu.memory_space<vmem>>, vector<1x4x512xf32>
    %4 = vector.shape_cast %3 : vector<1x4x512xf32> to vector<4x512xf32>
    %cst = arith.constant 0.000000e+00 : f32
    %5 = vector.broadcast %cst : f32 to vector<4x512xf32>
    %c0_i32_3 = arith.constant 0 : i32
    %c4_i32 = arith.constant 4 : i32
    %6 = arith.muli %c0_i32_3, %c4_i32 : i32
    %7 = tpu.assume_multiple %6, 4 : i32
    %8 = arith.index_cast %7 : i32 to index
    %c0_4 = arith.constant 0 : index
    %9 = vector.load %arg2[%8, %c0_4] : memref<4x512xf32, #tpu.memory_space<vmem>>, vector<4x512xf32>
    %10 = arith.index_cast %7 : i32 to index
    %c0_5 = arith.constant 0 : index
    %11 = vector.load %arg3[%10, %c0_5] : memref<4x512xf32, #tpu.memory_space<vmem>>, vector<4x512xf32>
    %12 = arith.mulf %9, %11 : vector<4x512xf32>
    %cst_6 = arith.constant 1.000000e+00 : f32
    %13 = vector.broadcast %cst_6 : f32 to vector<4x512xf32>
    %14 = arith.divf %13, %12 : vector<4x512xf32>
    %15 = arith.addf %5, %14 : vector<4x512xf32>
    %c1_i32 = arith.constant 1 : i32
    %16 = arith.addf %4, %15 : vector<4x512xf32>
    %c0_7 = arith.constant 0 : index
    %c0_8 = arith.constant 0 : index
    %c0_9 = arith.constant 0 : index
    %17 = vector.load %arg4[%c0_7, %c0_8, %c0_9] : memref<1x4x512xf32, #tpu.memory_space<vmem>>, vector<1x4x512xf32>
    %18 = vector.shape_cast %17 : vector<1x4x512xf32> to vector<4x512xf32>
    %19 = vector.shape_cast %16 : vector<4x512xf32> to vector<1x4x512xf32>
    tpu.vector_store %arg4[%c0_7, %c0_8, %c0_9], %19 {strides = array<i32>} : memref<1x4x512xf32, #tpu.memory_space<vmem>>, vector<1x4x512xf32>,
    return
  }
  func.func @transform_0(%arg0: i32, %arg1: i32) -> (i32, i32) {
    %c1_i32 = arith.constant 1 : i32
    %0 = arith.muli %arg0, %c1_i32 : i32
    %1 = arith.addi %0, %arg1 : i32
    %c0_i32 = arith.constant 0 : i32
    %2 = arith.minsi %1, %c0_i32 : i32
    %c0_i32_0 = arith.constant 0 : i32
    %c0_i32_1 = arith.constant 0 : i32
    return %2, %c0_i32_0 : i32, i32
  }
  func.func @transform_1(%arg0: i32, %arg1: i32) -> (i32, i32) {
    %c1_i32 = arith.constant 1 : i32
    %0 = arith.muli %arg0, %c1_i32 : i32
    %1 = arith.addi %0, %arg1 : i32
    %c0_i32 = arith.constant 0 : i32
    %2 = arith.minsi %1, %c0_i32 : i32
    %c0_i32_0 = arith.constant 0 : i32
    %c0_i32_1 = arith.constant 0 : i32
    return %2, %c0_i32_0 : i32, i32
  }
  func.func @transform_2(%arg0: i32, %arg1: i32) -> (i32, i32, i32) {
    %c0_i32 = arith.constant 0 : i32
    %c0_i32_0 = arith.constant 0 : i32
    %c0_i32_1 = arith.constant 0 : i32
    return %arg0, %c0_i32, %c0_i32_0 : i32, i32, i32
  }
}

</mosaic_0001>

<bundles_post_ra>
// kernel: tpu_custom_call.1
= control target key start
LH: loop header
LB: loop body
LE: loop exit
PB: predicated region body
PF: predicated region fallthrough
CT: control target
= control target key end

     0   :  { %7 = vsyncpa [#allocation3], 0  ;;  %s237_s0 = inlined_call_operand.hbm [shape: f32[4,512], index: 0, kind: input, shape index: {}]   ;;  %s238_s1 = inlined_call_operand.hbm [shape: f32[4,512], index: 1, kind: input, shape index: {}]   ;;  %s239_s2 = inlined_call_operand.hbm [shape: f32[1,4,512], index: 2, kind: output, shape index: {}]  }
   0x1   :  { %8 = vsyncpa [#allocation6], 0 }
   0x2   :  { %9 = vsyncpa [#allocation4], 0  ;;  %s183_s9 = smov [#allocation2]   ;;  %s184_s11 = smov [#allocation5]  }
   0x3   :  { %s22_s10 = sshll.u32 %s183_s9, 4  ;;  %s38_s12 = sshll.u32 %s184_s11, 4  ;;  %s23_s10 = int_to_ptr.vmem [resolvable:$true] %s22_s10  ;;  %s39_s12 = int_to_ptr.vmem [resolvable:$true] %s38_s12 }
   0x4   :  { %s111_s15 = scalar_lea.hbm %s237_s0, 256 }
   0x5   :  { %p112_p0 = scmp.ne.s32.totalorder %s237_s0, %s111_s15  ;;  %p115_p1 = scmp.lt.u32.totalorder %s111_s15, %s237_s0 }
   0x7   :  { %p117_p2 = pnand %p115_p1, %p112_p0 }
   0x9   :  { %120 = shalt.err (!%p117_p2)
}
   0xa   :  { %s121_s20 = scalar_lea.vmem %s23_s10, 256  ;;  %p126_p4 = scmp.lt.s32.totalorder %s23_s10, %s23_s10 }
   0xb   :  { %p122_p3 = scmp.ne.s32.totalorder %s23_s10, %s121_s20  ;;  %p127_p5 = scmp.lt.s32.totalorder %s121_s20, %s121_s20 }
   0xd   :  { %p128_p6 = por %p127_p5, %p126_p4 }
   0xf   :  { %p129_p7 = pnand %p128_p6, %p122_p3 }
  0x11   :  { %132 = shalt.err (!%p129_p7)
}
  0x12   :  { %25 = dma.hbm_to_vmem [thread:$0]  %s237_s0, 256, %s23_s10, [#allocation3]  }
  0x13   :  { %s133_s25 = scalar_lea.hbm %s238_s1, 256 }
  0x14   :  { %p134_p8 = scmp.ne.s32.totalorder %s238_s1, %s133_s25  ;;  %p137_p9 = scmp.lt.u32.totalorder %s133_s25, %s238_s1 }
  0x16   :  { %p139_p10 = pnand %p137_p9, %p134_p8 }
  0x18   :  { %142 = shalt.err (!%p139_p10)
}
  0x19   :  { %s143_s30 = scalar_lea.vmem %s39_s12, 256  ;;  %p148_p12 = scmp.lt.s32.totalorder %s39_s12, %s39_s12 }
  0x1a   :  { %p144_p11 = scmp.ne.s32.totalorder %s39_s12, %s143_s30  ;;  %p149_p13 = scmp.lt.s32.totalorder %s143_s30, %s143_s30 }
  0x1c   :  { %p150_p0 = por %p149_p13, %p148_p12 }
  0x1e   :  { %p151_p1 = pnand %p150_p0, %p144_p11 }
  0x20   :  { %154 = shalt.err (!%p151_p1)
}
  0x21   :  { %41 = dma.hbm_to_vmem [thread:$0]  %s238_s1, 256, %s39_s12, [#allocation6]  }
  0x22   :  { %177 = dma.done.wait [#allocation3], 256  }
  0x23   :  { %178 = vsyncadd [#allocation3], 4294967040 }
  0x24   :  { %179 = dma.done.wait [#allocation6], 256  }
  0x25   :  { %180 = vsyncadd [#allocation6], 4294967040  ;;  %v65_v0 = vld [vmem:[#allocation2] sm:$0xff]  ;;  %v69_v1 = vld [vmem:[#allocation5] sm:$0xff]  ;;  %s185_s4 = smov [#allocation7]  }
  0x26   :  { %v66_v2 = vld [vmem:[#allocation2 + $0x8] sm:$0xff]  ;;  %v71_v3 = vmul.f32 %v69_v1, %v65_v0  ;;  %v70_v4 = vld [vmem:[#allocation5 + $0x8] sm:$0xff]  ;;  %s89_s5 = sshll.u32 %s185_s4, 4  ;;  %s90_s5 = int_to_ptr.vmem [resolvable:$true] %s89_s5 }
  0x27   :  { %v72_v5 = vmul.f32 %v70_v4, %v66_v2  ;;  %s155_s1 = scalar_lea.vmem %s90_s5, 256  ;;  %p160_p3 = scmp.lt.s32.totalorder %s90_s5, %s90_s5 }
  0x28   :  { %107 = vrcp.f32 %v71_v3  ;;  %p156_p2 = scmp.ne.s32.totalorder %s90_s5, %s155_s1  ;;  %p161_p4 = scmp.lt.s32.totalorder %s155_s1, %s155_s1 }
  0x29   :  { %109 = vrcp.f32 %v72_v5 }
  0x2a   :  { %p162_p5 = por %p161_p4, %p160_p3 }
  0x2c   :  { %p163_p6 = pnand %p162_p5, %p156_p2 }
  0x32   :  { %v108_v6 = vpop.eup %107 }
  0x33   :  { %v110_v7 = vpop.eup %109  ;;  %81 = vst [vmem:[#allocation7] sm:$0xff] %v108_v6 }
  0x34   :  { %82 = vst [vmem:[#allocation7 + $0x8] sm:$0xff] %v110_v7 }
  0x35   :  { %166 = shalt.err (!%p163_p6)
}
  0x36   :  { %s167_s8 = scalar_lea.hbm %s239_s2, 256 }
  0x37   :  { %p168_p7 = scmp.ne.s32.totalorder %s239_s2, %s167_s8  ;;  %p171_p8 = scmp.lt.u32.totalorder %s167_s8, %s239_s2 }
  0x39   :  { %p173_p9 = pnand %p171_p8, %p168_p7 }
  0x3b   :  { %176 = shalt.err (!%p173_p9)
}
  0x3c   :  { %92 = dma.vmem_to_hbm [thread:$0]  %s90_s5, 256, %s239_s2, [#allocation4]  }
  0x3d   :  { %181 = dma.done.wait [#allocation4], 256  }
  0x3e   :  { %182 = vsyncadd [#allocation4], 4294967040 }
  0x3f   :  { %96 = vsyncpa [#allocation3], 1 }
  0x40   :  { %97 = vsyncpa [#allocation6], 1 }
  0x41   :  { %98 = vsyncpa [#allocation4], 1 }

</bundles_post_ra>
